<compile_context>
chip_gen: v7x
topology: tpu7x:2x2x1
jax: 0.10.0
libtpu: 0.0.40
codegen_flags: <defaults>
</compile_context>

<pallas_src>
import functools

import numpy as np

import jax
import jax.numpy as jnp
from jax.experimental import pallas as pl
from jax.experimental.pallas import tpu as pltpu


def upconv_kernel(x_ref, w_ref, shift_ref, o_ref):
    # x_ref:     (1, 1, TH+2, W+2, Cin)  original-resolution input tile (+1 halo ring)
    # w_ref:     (9*Cin, 4*Cout)         subpixel-folded conv * BN-scale weights
    # shift_ref: (1, 4*Cout)             folded BN shift (includes conv bias), f32
    # o_ref:     (1, TH, W, 4*Cout)      four output phases packed on the channel axis
    th = o_ref.shape[1]
    w = o_ref.shape[2]
    cin = x_ref.shape[4]

    x = x_ref[0, 0]                                        # (TH+2, W+2, Cin)

    # im2col: 3x3 neighborhood of every original-resolution pixel, built once.
    patches = []
    for ty in range(3):
        for tx in range(3):
            patches.append(x[ty:ty + th, tx:tx + w, :].reshape(th * w, cin))
    p = jnp.concatenate(patches, axis=-1)                  # (TH*W, 9*Cin)

    # Single MXU matmul producing all 4 subpixel phases; f32 accumulation.
    acc = jnp.dot(p, w_ref[...], preferred_element_type=jnp.float32)  # (TH*W, 4*Cout)

    # Epilogue in f32: folded BatchNorm shift (+conv bias) and ReLU.
    y = jnp.maximum(acc + shift_ref[0], 0.0)
    o_ref[0] = y.reshape(th, w, -1).astype(o_ref.dtype)


# Row/column combination matrices of the subpixel decomposition.
# _PHASE_MIX[a, ty, dy]: contribution of the original 3x3-kernel row dy to the effective
# tap ty (0:-1, 1:0, 2:+1) acting on ORIGINAL-resolution rows, for output row parity a.
_PHASE_MIX = np.array(
    [[[1., 0., 0.],
      [0., 1., 1.],
      [0., 0., 0.]],
     [[0., 0., 0.],
      [1., 1., 0.],
      [0., 0., 1.]]], dtype=np.float32)


def _pick_tile_h(h, w, cin, cout, in_itemsize, out_itemsize,
                 budget_bytes=6 * 1024 * 1024):
    """Largest divisor of H whose double-buffered (input + output) tiles fit budget."""
    best = 1
    for th in range(1, h + 1):
        if h % th:
            continue
        in_b = (th + 2) * (w + 2) * cin * in_itemsize
        out_b = th * w * 4 * cout * out_itemsize
        if 2 * (in_b + out_b) <= budget_bytes:
            best = th
    return best


def _upconv_packed(x_nhwc, weight_oihw, conv_bias, gamma, beta, running_mean,
                   running_var, eps, tile_h, compute_dtype):
    """Runs the Pallas kernel; returns phase-packed output (N, H, W, 4*Cout)."""
    n, h, w, cin = x_nhwc.shape
    cout = weight_oihw.shape[0]
    out_dtype = x_nhwc.dtype
    in_itemsize = jnp.dtype(compute_dtype).itemsize
    out_itemsize = jnp.dtype(out_dtype).itemsize

    if tile_h is None:
        tile_h = _pick_tile_h(h, w, cin, cout, in_itemsize, out_itemsize)
    assert h % tile_h == 0, (h, tile_h)
    n_t = h // tile_h

    # ---- BatchNorm (eval) folded into the conv weights; only "+shift" stays in-kernel.
    # TODO(synk): BatchNorm is eval-mode (running stats); training-mode batch statistics
    # are not computed.
    f32 = jnp.float32
    inv_std = 1.0 / jnp.sqrt(running_var.astype(f32) + eps)
    scale = gamma.astype(f32) * inv_std                                    # (Cout,)
    shift = beta.astype(f32) + (conv_bias.astype(f32)
                                - running_mean.astype(f32)) * scale        # (Cout,)
    w_hwio = jnp.transpose(weight_oihw, (2, 3, 1, 0)).astype(f32) * scale  # (3,3,Cin,Cout)

    # ---- subpixel weights: w_all[(ty, tx, ci), (a, b, co)]
    m = jnp.asarray(_PHASE_MIX)
    w_all = jnp.einsum("ayd,bxe,deio->yxiabo", m, m, w_hwio)
    w_all = w_all.reshape(9 * cin, 4 * cout).astype(compute_dtype)
    shift4 = jnp.tile(shift, 4).reshape(1, 4 * cout)                       # f32

    # ---- pad at ORIGINAL resolution and gather overlapping row tiles (1-row halo).
    # (One cheap pass over the 4x-smaller original input; fuses with the layout ops,
    #  and keeps every BlockSpec a plain Blocked spec.)
    xp = jnp.pad(x_nhwc, ((0, 0), (1, 1), (1, 1), (0, 0)))
    rows = (jnp.arange(n_t) * tile_h)[:, None] + jnp.arange(tile_h + 2)[None, :]
    x_tiles = xp[:, rows].astype(compute_dtype)        # (N, n_t, TH+2, W+2, Cin)

    in_tile_bytes = (tile_h + 2) * (w + 2) * cin * in_itemsize
    out_tile_bytes = tile_h * w * 4 * cout * out_itemsize
    vmem_limit = int(min(64 * 1024 * 1024,
                         max(8 * 1024 * 1024,
                             4 * (in_tile_bytes + out_tile_bytes))))

    return pl.pallas_call(
        upconv_kernel,
        out_shape=jax.ShapeDtypeStruct((n, h, w, 4 * cout), out_dtype),
        grid=(n, n_t),
        in_specs=[
            pl.BlockSpec((1, 1, tile_h + 2, w + 2, cin),
                         lambda i, t: (i, t, 0, 0, 0)),
            pl.BlockSpec((9 * cin, 4 * cout), lambda i, t: (0, 0)),
            pl.BlockSpec((1, 4 * cout), lambda i, t: (0, 0)),
        ],
        out_specs=pl.BlockSpec((1, tile_h, w, 4 * cout),
                               lambda i, t: (i, t, 0, 0)),
        compiler_params=pltpu.CompilerParams(
            dimension_semantics=("parallel", "parallel"),
            vmem_limit_bytes=vmem_limit),
    )(x_tiles, w_all, shift4)


def upconv_nhwc(x_nhwc, weight_oihw, conv_bias, gamma, beta, running_mean,
                running_var, eps=1e-5, tile_h=None, compute_dtype=jnp.float32):
    """UpConv forward, NHWC in / NHWC out (TPU-preferred: no layout transposes)."""
    p = _upconv_packed(x_nhwc, weight_oihw, conv_bias, gamma, beta,
                       running_mean, running_var, eps, tile_h, compute_dtype)
    n, h, w, c4 = p.shape
    cout = c4 // 4
    # depth-to-space: single fused transpose over the output.
    y = p.reshape(n, h, w, 2, 2, cout).transpose(0, 1, 3, 2, 4, 5)
    return y.reshape(n, 2 * h, 2 * w, cout)


def upconv(x_nchw, weight_oihw, conv_bias, gamma, beta, running_mean,
           running_var, eps=1e-5, tile_h=None, compute_dtype=jnp.float32):
    """UpConv forward, NCHW in / NCHW out (PyTorch convention)."""
    x_nhwc = jnp.transpose(x_nchw, (0, 2, 3, 1))   # fuses with pad + tile gather in XLA
    p = _upconv_packed(x_nhwc, weight_oihw, conv_bias, gamma, beta,
                       running_mean, running_var, eps, tile_h, compute_dtype)
    n, h, w, c4 = p.shape
    cout = c4 // 4
    # depth-to-space + NHWC->NCHW as one fused transpose over the output.
    y = p.reshape(n, h, w, 2, 2, cout).transpose(0, 5, 1, 3, 2, 4)
    return y.reshape(n, cout, 2 * h, 2 * w)


def ref_upconv(x_nchw, weight_oihw, conv_bias, gamma, beta, rm, rv, eps=1e-5):
    """Pure-JAX reference (NCHW) replicating the PyTorch forward (BN eval)."""
    x = jnp.repeat(jnp.repeat(x_nchw, 2, axis=2), 2, axis=3)
    y = jax.lax.conv_general_dilated(
        x, weight_oihw, window_strides=(1, 1), padding=((1, 1), (1, 1)),
        dimension_numbers=("NCHW", "OIHW", "NCHW"))
    y = y + conv_bias[None, :, None, None]
    y = (y - rm[None, :, None, None]) * (1.0 / jnp.sqrt(rv + eps))[None, :, None, None]
    y = y * gamma[None, :, None, None] + beta[None, :, None, None]
    return jnp.maximum(y, 0.0)


if __name__ == "__main__":
    key = jax.random.PRNGKey(0)
    k_x, k_w, k_b, k_g, k_be, k_rm, k_rv = jax.random.split(key, 7)

    N, Cin, Cout, H, W = 2, 4, 8, 16, 16

    x = jax.random.normal(k_x, (N, Cin, H, W), jnp.float32)
    weight = jax.random.normal(k_w, (Cout, Cin, 3, 3), jnp.float32) * 0.1
    conv_bias = jax.random.normal(k_b, (Cout,), jnp.float32) * 0.1
    gamma = 1.0 + 0.1 * jax.random.normal(k_g, (Cout,), jnp.float32)
    beta = 0.1 * jax.random.normal(k_be, (Cout,), jnp.float32)
    running_mean = 0.1 * jax.random.normal(k_rm, (Cout,), jnp.float32)
    running_var = 1.0 + 0.1 * jax.random.uniform(k_rv, (Cout,), jnp.float32)

    ref = ref_upconv(x, weight, conv_bias, gamma, beta, running_mean, running_var)

    # f32 path, spatial row tiling exercised: grid = (N, H // tile_h) = (2, 2).
    upconv_f32 = jax.jit(functools.partial(upconv, tile_h=8))
    out = jax.block_until_ready(
        upconv_f32(x, weight, conv_bias, gamma, beta, running_mean, running_var))
    assert out.shape == (N, Cout, 2 * H, 2 * W), out.shape
    assert jnp.allclose(out, ref, atol=1e-4, rtol=1e-4), \
        float(jnp.max(jnp.abs(out - ref)))

    # NHWC entry point (no NCHW boundary transposes) must agree.
    out_nhwc = jax.block_until_ready(
        jax.jit(functools.partial(upconv_nhwc, tile_h=8))(
            jnp.transpose(x, (0, 2, 3, 1)), weight, conv_bias, gamma, beta,
            running_mean, running_var))
    assert jnp.allclose(jnp.transpose(out_nhwc, (0, 3, 1, 2)), ref,
                        atol=1e-4, rtol=1e-4)

    # bf16 MXU inputs (f32 accumulate / f32 epilogue) -- recommended mode on v6e/v7x.
    upconv_bf16 = jax.jit(functools.partial(upconv, tile_h=8,
                                            compute_dtype=jnp.bfloat16))
    out_bf16 = jax.block_until_ready(
        upconv_bf16(x, weight, conv_bias, gamma, beta, running_mean, running_var))
    assert jnp.allclose(out_bf16, ref, atol=5e-2, rtol=5e-2), \
        float(jnp.max(jnp.abs(out_bf16 - ref)))

    print("KERNEL_OK")
</pallas_src>

<mosaic_0001>
module attributes {stable_mosaic.version = 11 : i64} {
  func.func @upconv_kernel(%arg0: i32, %arg1: i32, %arg2: memref<1x1x10x18x4xf32, #tpu.memory_space<vmem>>, %arg3: memref<36x32xf32, #tpu.memory_space<vmem>>, %arg4: memref<1x32xf32, #tpu.memory_space<vmem>>, %arg5: memref<1x8x16x32xf32, #tpu.memory_space<vmem>>) attributes {dimension_semantics = [#tpu.dimension_semantics<parallel>, #tpu.dimension_semantics<parallel>], iteration_bounds = array<i64: 2, 2>, scalar_prefetch = 0 : i64, scratch_operands = 0 : i64, tpu.core_type = #tpu.core_type<tc>, window_params = [{transform_indices = @transform_0, window_bounds = array<i64: 1, 1, 10, 18, 4>}, {pipeline_mode = #tpu.pipeline_mode<synchronous>, transform_indices = @transform_1, window_bounds = array<i64: 36, 32>}, {pipeline_mode = #tpu.pipeline_mode<synchronous>, transform_indices = @transform_2, window_bounds = array<i64: 1, 32>}, {transform_indices = @transform_3, window_bounds = array<i64: 1, 8, 16, 32>}]} {
    %c0 = arith.constant 0 : index
    %c0_0 = arith.constant 0 : index
    %c0_1 = arith.constant 0 : index
    %c0_2 = arith.constant 0 : index
    %c0_3 = arith.constant 0 : index
    %0 = vector.load %arg2[%c0, %c0_0, %c0_1, %c0_2, %c0_3] : memref<1x1x10x18x4xf32, #tpu.memory_space<vmem>>, vector<1x1x10x18x4xf32>
    %1 = vector.shape_cast %0 : vector<1x1x10x18x4xf32> to vector<10x18x4xf32>
    %2 = vector.extract_strided_slice %1 {offsets = [0, 0, 0], sizes = [8, 16, 4], strides = [1, 1, 1]} : vector<10x18x4xf32> to vector<8x16x4xf32>
    %3 = vector.shape_cast %2 : vector<8x16x4xf32> to vector<128x4xf32>
    %4 = vector.extract_strided_slice %1 {offsets = [0, 1, 0], sizes = [8, 16, 4], strides = [1, 1, 1]} : vector<10x18x4xf32> to vector<8x16x4xf32>
    %5 = vector.shape_cast %4 : vector<8x16x4xf32> to vector<128x4xf32>
    %6 = vector.extract_strided_slice %1 {offsets = [0, 2, 0], sizes = [8, 16, 4], strides = [1, 1, 1]} : vector<10x18x4xf32> to vector<8x16x4xf32>
    %7 = vector.shape_cast %6 : vector<8x16x4xf32> to vector<128x4xf32>
    %8 = vector.extract_strided_slice %1 {offsets = [1, 0, 0], sizes = [8, 16, 4], strides = [1, 1, 1]} : vector<10x18x4xf32> to vector<8x16x4xf32>
    %9 = vector.shape_cast %8 : vector<8x16x4xf32> to vector<128x4xf32>
    %10 = vector.extract_strided_slice %1 {offsets = [1, 1, 0], sizes = [8, 16, 4], strides = [1, 1, 1]} : vector<10x18x4xf32> to vector<8x16x4xf32>
    %11 = vector.shape_cast %10 : vector<8x16x4xf32> to vector<128x4xf32>
    %12 = vector.extract_strided_slice %1 {offsets = [1, 2, 0], sizes = [8, 16, 4], strides = [1, 1, 1]} : vector<10x18x4xf32> to vector<8x16x4xf32>
    %13 = vector.shape_cast %12 : vector<8x16x4xf32> to vector<128x4xf32>
    %14 = vector.extract_strided_slice %1 {offsets = [2, 0, 0], sizes = [8, 16, 4], strides = [1, 1, 1]} : vector<10x18x4xf32> to vector<8x16x4xf32>
    %15 = vector.shape_cast %14 : vector<8x16x4xf32> to vector<128x4xf32>
    %16 = vector.extract_strided_slice %1 {offsets = [2, 1, 0], sizes = [8, 16, 4], strides = [1, 1, 1]} : vector<10x18x4xf32> to vector<8x16x4xf32>
    %17 = vector.shape_cast %16 : vector<8x16x4xf32> to vector<128x4xf32>
    %18 = vector.extract_strided_slice %1 {offsets = [2, 2, 0], sizes = [8, 16, 4], strides = [1, 1, 1]} : vector<10x18x4xf32> to vector<8x16x4xf32>
    %19 = vector.shape_cast %18 : vector<8x16x4xf32> to vector<128x4xf32>
    %20 = tpu.concatenate %3, %5, %7, %9, %11, %13, %15, %17, %19 in 1 : vector<128x4xf32>, vector<128x4xf32>, vector<128x4xf32>, vector<128x4xf32>, vector<128x4xf32>, vector<128x4xf32>, vector<128x4xf32>, vector<128x4xf32>, vector<128x4xf32> -> vector<128x36xf32>
    %c0_4 = arith.constant 0 : index
    %c0_5 = arith.constant 0 : index
    %21 = vector.load %arg3[%c0_4, %c0_5] : memref<36x32xf32, #tpu.memory_space<vmem>>, vector<36x32xf32>
    %cst = arith.constant dense<0.000000e+00> : vector<128x32xf32>
    %22 = tpu.matmul %20, %21, %cst {dimension_numbers = #tpu.dot_dimension_numbers<[1], [0], [0], [1], [0, 0, 1, 1], [], []>} : vector<128x36xf32>, vector<36x32xf32>, vector<128x32xf32> -> vector<128x32xf32>
    %c0_6 = arith.constant 0 : index
    %c0_7 = arith.constant 0 : index
    %23 = vector.load %arg4[%c0_6, %c0_7] : memref<1x32xf32, #tpu.memory_space<vmem>>, vector<1x32xf32>
    %24 = vector.shape_cast %23 : vector<1x32xf32> to vector<32xf32>
    %25 = vector.shape_cast %24 : vector<32xf32> to vector<1x32xf32>
    %26 = vector.broadcast %25 : vector<1x32xf32> to vector<128x32xf32>
    %27 = arith.addf %22, %26 : vector<128x32xf32>
    %cst_8 = arith.constant 0.000000e+00 : f32
    %28 = vector.broadcast %cst_8 : f32 to vector<128x32xf32>
    %29 = arith.maximumf %27, %28 : vector<128x32xf32>
    %30 = vector.shape_cast %29 : vector<128x32xf32> to vector<8x16x32xf32>
    %c0_9 = arith.constant 0 : index
    %c0_10 = arith.constant 0 : index
    %c0_11 = arith.constant 0 : index
    %c0_12 = arith.constant 0 : index
    %31 = vector.load %arg5[%c0_9, %c0_10, %c0_11, %c0_12] : memref<1x8x16x32xf32, #tpu.memory_space<vmem>>, vector<1x8x16x32xf32>
    %32 = vector.shape_cast %31 : vector<1x8x16x32xf32> to vector<8x16x32xf32>
    %33 = vector.shape_cast %30 : vector<8x16x32xf32> to vector<1x8x16x32xf32>
    tpu.vector_store %arg5[%c0_9, %c0_10, %c0_11, %c0_12], %33 {strides = array<i32>} : memref<1x8x16x32xf32, #tpu.memory_space<vmem>>, vector<1x8x16x32xf32>,
    return
  }
  func.func @transform_0(%arg0: i32, %arg1: i32) -> (i32, i32, i32, i32, i32) {
    %c0_i32 = arith.constant 0 : i32
    %c0_i32_0 = arith.constant 0 : i32
    %c0_i32_1 = arith.constant 0 : i32
    %c0_i32_2 = arith.constant 0 : i32
    return %arg0, %arg1, %c0_i32, %c0_i32_0, %c0_i32_1 : i32, i32, i32, i32, i32
  }
  func.func @transform_1(%arg0: i32, %arg1: i32) -> (i32, i32) {
    %c0_i32 = arith.constant 0 : i32
    %c0_i32_0 = arith.constant 0 : i32
    %c0_i32_1 = arith.constant 0 : i32
    return %c0_i32, %c0_i32_0 : i32, i32
  }
  func.func @transform_2(%arg0: i32, %arg1: i32) -> (i32, i32) {
    %c0_i32 = arith.constant 0 : i32
    %c0_i32_0 = arith.constant 0 : i32
    %c0_i32_1 = arith.constant 0 : i32
    return %c0_i32, %c0_i32_0 : i32, i32
  }
  func.func @transform_3(%arg0: i32, %arg1: i32) -> (i32, i32, i32, i32) {
    %c0_i32 = arith.constant 0 : i32
    %c0_i32_0 = arith.constant 0 : i32
    %c0_i32_1 = arith.constant 0 : i32
    return %arg0, %arg1, %c0_i32, %c0_i32_0 : i32, i32, i32, i32
  }
}

</mosaic_0001>

<bundles_post_ra>
// kernel: tile.9
= control target key start
LH: loop header
LB: loop body
LE: loop exit
PB: predicated region body
PF: predicated region fallthrough
CT: control target
= control target key end

     0   :  { %vm7_vm0 = vcmask 64512   ;;  %s37_s8 = smov 8   ;;  %s38_s9 = smov 16   ;;  %vm13_vm1 = vcmask 261312   ;;  %vm19_vm2 = vcmask 195712   ;;  %vm25_vm3 = vcmask 130112   ;;  %s55_s0 = inlined_call_operand.vmem [shape: f32[4,8], index: 0, kind: input, shape index: {}]   ;;  %s56_s1 = inlined_call_operand.vmem [shape: f32[1,32], index: 1, kind: output, shape index: {}]  }
   0x1   :  { %v4_v0 = vld [vmem:[%s55_s0] sm:$0xf]  ;;  %s36_s0 = smov 24  }
   0x2   :  { %5 = vst [vmem:[#allocation1] sm:$0xf] %v4_v0 }
   0x9   :  { %v10_v1 = vld [vmem:[#allocation1 + $0x3] sm:$0x1]   ;;  %v22_v2 = vld [vmem:[#allocation1 + $0x1] sm:$0x1]   ;;  %v6_v3 = vld [vmem:[#allocation1] sm:$0x1]  }
   0xa   :  { %11 = vrot.lane.b32.xlu0 %v10_v1, %s36_s0  ;;  %23 = vrot.lane.b32.xlu1 %v22_v2, %s37_s8  ;;  %v16_v4 = vld [vmem:[#allocation1 + $0x2] sm:$0x1]   ;;  %8 = vst.msk [vmem:[#allocation0] sm:$0x1] %vm7_vm0, %v6_v3  }
   0xe   :  { %17 = vrot.lane.b32.xlu0 %v16_v4, %s38_s9 }
  0x7c   :  { %v12_v5 = vpop.permute.xlu0 %11   ;;  %v24_v6 = vpop.permute.xlu1 %23  }
  0x7d   :  { %14 = vst.msk [vmem:[#allocation0] sm:$0x1] %vm13_vm1, %v12_v5  }
  0x80   :  { %v18_v7 = vpop.permute.xlu0 %17  }
  0x81   :  { %20 = vst.msk [vmem:[#allocation0] sm:$0x1] %vm19_vm2, %v18_v7  }
  0x82   :  { %26 = vst.msk [vmem:[#allocation0] sm:$0x1] %vm25_vm3, %v24_v6  }
  0x89   :  { %v30_v8 = vld [vmem:[#allocation0] sm:$0x1] }
  0x8a   :  { %32 = vst [vmem:[%s56_s1] sm:$0x1] %v30_v8 }

// kernel: tile.8
= control target key start
LH: loop header
LB: loop body
LE: loop exit
PB: predicated region body
PF: predicated region fallthrough
CT: control target
= control target key end

     0   :  { %s22_s0 = inlined_call_operand.vmem [shape: f32[8], index: 0, kind: input, shape index: {}]   ;;  %s23_s1 = inlined_call_operand.vmem [shape: f32[4,8], index: 1, kind: output, shape index: {}]  }
   0x1   :  { %v4_v0 = vld [vmem:[%s22_s0] ss:$0 sm:$0xff] }
   0x2   :  { %5 = vst [vmem:[%s23_s1] sm:$0xf] %v4_v0 }

// kernel: upconv.1
= control target key start
LH: loop header
LB: loop body
LE: loop exit
PB: predicated region body
PF: predicated region fallthrough
CT: control target
= control target key end

     0   :  { %s1450_s12 = smov 0   ;;  %s1452_s13 = smov 0   ;;  %s2190_s0 = inlined_call_operand.vmem [shape: f32[2,2,10,18,4], index: 0, kind: input, shape index: {}]   ;;  %s2191_s1 = inlined_call_operand.vmem [shape: f32[36,32], index: 1, kind: input, shape index: {}]   ;;  %s2192_s2 = inlined_call_operand.vmem [shape: f32[1,32], index: 2, kind: input, shape index: {}]   ;;  %s2193_s3 = inlined_call_operand.vmem [shape: f32[2,16,16,32], index: 3, kind: output, shape index: {}]  }
   0x1   :  { %s1454_s14 = smov 0   ;;  %s1456_s15 = smov 0  }
   0x2   :  { %s1458_s16 = smov 0  }
   0x3 LB: > { %s22_s17 = sadd.s32 1, %s1412_s14  ;;  %s25_s18 = sadd.s32 1, %s1416_s15  ;;  %s1420_s16 = sphi %s1458_s16, %s13_s16   ;;  %s1416_s15 = sphi %s1456_s15, %s2224_s15   ;;  %s1412_s14 = sphi %s1454_s14, %s2223_s14   ;;  %s1408_s13 = sphi %s1452_s13, %s2222_s13   ;;  %s1404_s12 = sphi %s1450_s12, %s2221_s12  }
   0x4   : > { %p23_p0 = scmp.ge.s32.totalorder %s22_s17, 2  ;;  %p1237_p1 = scmp.ge.s32.totalorder %s1420_s16, 1 }
   0x5   : > { %p157_p2 = scmp.lt.s32.totalorder %s1420_s16, 5 }
   0x6   : > { %s2226_s17 = smov (%p23_p0, %s22_s17), 0  ;;  %s2228_s18 = smov (!%p23_p0, %s25_s18), %s1416_s15 }
   0x7   : > { %p158_p3 = pnand %p1237_p1, %p157_p2  ;;  %p27_p4 = scmp.ge.s32.totalorder %s2228_s18, 2 }
   0x9   : > { %s2230_s18 = smov (%p27_p4, %s2228_s18), 0  ;;  %161 = sbr.rel (%p158_p3) target bundleno = 617 (0x269), region = 32 }
  0x10   : > { %p190_p5 = scmp.lt.s32.totalorder %s1408_s13, 1  ;;  %p192_p6 = scmp.lt.s32.totalorder %s1404_s12, 1  ;;  %vm264_vm0 = vcmask 1046528   ;;  %vm305_vm1 = vcmask 1045504   ;;  %vm953_vm2 = vcmask 1043456   ;;  %vm756_vm3 = vcmask 31744  }
  0x11   : > { %s1422_s27 = smov 4   ;;  %s1423_s28 = smov 8   ;;  %vm773_vm4 = vcmask 64512   ;;  %vm790_vm5 = vcmask 97280   ;;  %vm807_vm6 = vcmask 130048   ;;  %vm824_vm7 = vcmask 162816  }
  0x12   : > { %s2232_s13 = smov (!%p190_p5, %s1408_s13), 1  ;;  %s1424_s29 = smov 12   ;;  %vm841_vm8 = vcmask 195584   ;;  %vm858_vm9 = vcmask 228352   ;;  %vm875_vm10 = vcmask 261120   ;;  %vm904_vm11 = vcmask 293888  }
  0x13   : > { %s193_s19 = scalar_select %p192_p6, %s1404_s12, 1 }
  0x14   : > { %s1333_s20 = smul.u32 60, %s2232_s13  ;;  %s1425_s30 = smov 16  }
  0x15   : > { %s1332_s21 = smul.u32 30, %s193_s19  ;;  %s1426_s4 = smov 20  }
  0x16   : > { %s1427_s5 = smov 24   ;;  %s1428_s6 = smov 28  }
  0x17   : > { %s196_s22 = sadd.s32 %s1333_s20, %s1332_s21  ;;  %s1239_s25 = sshll.u32 %s1404_s12, 3 }
  0x18   : > { %s1238_s23 = sshll.u32 %s196_s22, 3  ;;  %s1429_s22 = smov 32  }
  0x19   : > { %s1490_s26 = scalar_lea.vmem %s2190_s0, %s1238_s23  ;;  %p202_p7 = scmp.lt.s32.totalorder %s1239_s25, 15 }
  0x1a   : > { %v1493_v0 = vld [vmem:[%s1490_s26 + $0x8] sm:$0xff]  ;;  %v212_v1 = vld [vmem:[%s1490_s26 + $0x10] sm:$0x3]  ;;  %v1497_v2 = vld [vmem:[%s1490_s26] sm:$0xff] }
  0x1b   : > { %v266_v3 = vrot.slane %v1493_v0, 1  ;;  %v268_v4 = vrot.slane %v212_v1, 1  ;;  %v265_v5 = vrot.slane %v1497_v2, 1  ;;  %v1502_v6 = vld [vmem:[%s1490_s26 + $0x68] sm:$0xff]  ;;  %v224_v7 = vld [vmem:[%s1490_s26 + $0x70] sm:$0x3] }
  0x1c   : > { %v286_v8 = vrot.slane %v1502_v6, 1  ;;  %v288_v9 = vrot.slane %v224_v7, 1  ;;  %v1507_v10 = vld [vmem:[%s1490_s26 + $0x60] sm:$0xff]  ;;  %v327_v14 = vrot.slane %v1502_v6, 2  ;;  %v306_v15 = vrot.slane %v1497_v2, 2  ;;  %v1543_v26 = vld [vmem:[%s1490_s26 + $0x78] sm:$0xff] }
  0x1d   : > { %v269_v11 = vsel %vm264_vm0, %v266_v3, %v268_v4  ;;  %v267_v12 = vsel %vm264_vm0, %v265_v5, %v266_v3  ;;  %v285_v13 = vrot.slane %v1507_v10, 1  ;;  %v326_v18 = vrot.slane %v1507_v10, 2  ;;  %v1546_v27 = vld [vmem:[%s1490_s26 + $0x18] sm:$0xff]  ;;  %v1549_v28 = vld [vmem:[%s1490_s26 + $0x80] sm:$0xff]  ;;  %v227_v36 = vld [vmem:[%s1490_s26 + $0x88] sm:$0x3] }
  0x1e   : > { %374 = vrot.lane.b32.xlu1 %v269_v11, %s1422_s27  ;;  %372 = vrot.lane.b32.xlu0 %v267_v12, %s1422_s27  ;;  %v1517_v16 = vsel %vm264_vm0, %v286_v8, %v288_v9  ;;  %v307_v19 = vrot.slane %v1493_v0, 2  ;;  %v329_v22 = vrot.slane %v224_v7, 2  ;;  %v309_v23 = vrot.slane %v212_v1, 2  ;;  %v1552_v29 = vld [vmem:[%s1490_s26 + $0x20] sm:$0xff]  ;;  %v215_v37 = vld [vmem:[%s1490_s26 + $0x28] sm:$0x3] }
  0x1f   : > { %v1520_v17 = vsel %vm264_vm0, %v285_v13, %v286_v8  ;;  %v1529_v20 = vsel %vm305_vm1, %v326_v18, %v327_v14  ;;  %v290_v30 = vrot.slane %v1543_v26, 1  ;;  %v291_v31 = vrot.slane %v1549_v28, 1  ;;  %v1610_v52 = vld [vmem:[%s1490_s26 + $0x90] sm:$0xff]  ;;  %v1623_v54 = vld [vmem:[%s1490_s26 + $0x98] sm:$0xff]  ;;  %v230_v62 = vld [vmem:[%s1490_s26 + $0xa0] sm:$0x3] }
  0x20   : > { %v308_v21 = vsel %vm305_vm1, %v306_v15, %v307_v19  ;;  %v1536_v24 = vsel %vm305_vm1, %v327_v14, %v329_v22  ;;  %v310_v25 = vsel %vm305_vm1, %v307_v19, %v309_v23  ;;  %v270_v32 = vrot.slane %v1546_v27, 1  ;;  %v1613_v53 = vld [vmem:[%s1490_s26 + $0x30] sm:$0xff]  ;;  %v1626_v55 = vld [vmem:[%s1490_s26 + $0x38] sm:$0xff]  ;;  %v218_v63 = vld [vmem:[%s1490_s26 + $0x40] sm:$0x3]  ;;  %s2234_s25 = smov (!%p202_p7, %s1239_s25), 15 }
  0x21   : > { %v271_v33 = vrot.slane %v1552_v29, 1  ;;  %v1567_v34 = vsel %vm264_vm0, %v290_v30, %v291_v31  ;;  %v293_v38 = vrot.slane %v227_v36, 1  ;;  %v273_v39 = vrot.slane %v215_v37, 1  ;;  %2207 = vst [vmem:[#allocation6_spill] sm:$0xff] %v1626_v55  ;;  %v892_v8 = vld [vmem:[%s2191_s1] sm:$0xff]  ;;  %v893_v9 = vld [vmem:[%s2191_s1 + $0x8] sm:$0xff] }
  0x22   : > { %390 = vrot.lane.b32.xlu1 %v1517_v16, %s1422_s27  ;;  %388 = vrot.lane.b32.xlu0 %v1520_v17, %s1422_s27  ;;  %2203 = vst [vmem:[#allocation2_spill] sm:$0xff] %v1567_v34  ;;  %v331_v40 = vrot.slane %v1543_v26, 2  ;;  %v332_v41 = vrot.slane %v1549_v28, 2  ;;  %v311_v44 = vrot.slane %v1546_v27, 2  ;;  %v312_v45 = vrot.slane %v1552_v29, 2  ;;  %v894_v15 = vld [vmem:[%s2191_s1 + $0x10] sm:$0xff] }
  0x23   : > { %v272_v35 = vsel %vm264_vm0, %v270_v32, %v271_v33  ;;  %v1581_v42 = vsel %vm264_vm0, %v291_v31, %v293_v38  ;;  %v274_v43 = vsel %vm264_vm0, %v271_v33, %v273_v39  ;;  %v334_v48 = vrot.slane %v227_v36, 2  ;;  %v895_v18 = vld [vmem:[%s2191_s1 + $0x18] sm:$0xff]  ;;  %v896_v23 = vld [vmem:[%s2191_s1 + $0x20] sm:$0xf]  ;;  %v1696_v33 = vld [vmem:[%s1490_s26 + $0xa8] sm:$0xff] }
  0x24   : > { %2204 = vst [vmem:[#allocation3_spill] sm:$0xff] %v1581_v42  ;;  %v1590_v46 = vsel %vm305_vm1, %v331_v40, %v332_v41  ;;  %v313_v47 = vsel %vm305_vm1, %v311_v44, %v312_v45  ;;  %v314_v49 = vrot.slane %v215_v37, 2  ;;  %v295_v56 = vrot.slane %v1610_v52, 1  ;;  %2208 = vst [vmem:[#allocation7_spill] sm:$0xff] %v1696_v33  ;;  %v1723_v44 = vld [vmem:[%s1490_s26 + $0x50] sm:$0xff] }
  0x25   : > { %2205 = vst [vmem:[#allocation4_spill] sm:$0xff] %v1590_v46  ;;  %v1603_v50 = vsel %vm305_vm1, %v332_v41, %v334_v48  ;;  %v296_v57 = vrot.slane %v1623_v54, 1  ;;  %v275_v58 = vrot.slane %v1613_v53, 1  ;;  %v276_v59 = vrot.slane %v1626_v55, 1  ;;  %2211 = vst [vmem:[#allocation10_spill] sm:$0xff] %v1723_v44 }
  0x26   : > { %436 = vrot.lane.b32.xlu1 %v1529_v20, %s1423_s28  ;;  %420 = vrot.lane.b32.xlu0 %v308_v21, %s1423_s28  ;;  %2206 = vst [vmem:[#allocation5_spill] sm:$0xff] %v1603_v50  ;;  %v315_v51 = vsel %vm305_vm1, %v312_v45, %v314_v49  ;;  %v298_v1 = vrot.slane %v230_v62, 1  ;;  %v278_v3 = vrot.slane %v218_v63, 1  ;;  %v336_v4 = vrot.slane %v1610_v52, 2 }
  0x27   : > { %v297_v60 = vsel %vm264_vm0, %v295_v56, %v296_v57  ;;  %v277_v61 = vsel %vm264_vm0, %v275_v58, %v276_v59  ;;  %v337_v5 = vrot.slane %v1623_v54, 2  ;;  %v316_v7 = vrot.slane %v1613_v53, 2 }
  0x28   : > { %v299_v11 = vsel %vm264_vm0, %v296_v57, %v298_v1  ;;  %v279_v12 = vsel %vm264_vm0, %v276_v59, %v278_v3  ;;  %v317_v13 = vrot.slane %v1626_v55, 2  ;;  %v1318_v14 = vpack.c.bf16 %v893_v9, %v892_v8 }
  0x29   : > { %v338_v19 = vsel %vm305_vm1, %v336_v4, %v337_v5  ;;  %v1322_v22 = vpack.c.bf16 %v895_v18, %v894_v15  ;;  %v319_v30 = vrot.slane %v218_v63, 2  ;;  %v300_v45 = vrot.slane %v1696_v33, 1 }
  0x2a   : > { %438 = vrot.lane.b32.xlu1 %v1536_v24, %s1423_s28  ;;  %422 = vrot.lane.b32.xlu0 %v310_v25, %s1423_s28  ;;  %v318_v21 = vsel %vm305_vm1, %v316_v7, %v317_v13  ;;  %v339_v25 = vrot.slane %v230_v62, 2  ;;  %v281_v49 = vrot.slane %v1723_v44, 1  ;;  %v221_v62 = vld [vmem:[%s1490_s26 + $0x58] sm:$0x3] }
  0x2b   : > { %1319 = vmatprep.subr.bf16.mxu0 %v1318_v14  ;;  %1326 = vmatprep.subr.bf16.mxu1 %v1318_v14  ;;  %v320_v32 = vsel %vm305_vm1, %v317_v13, %v319_v30  ;;  %v283_v4 = vrot.slane %v221_v62, 1 }
  0x2c   : > { %1321 = vmatpush3.bf16.msra.mxu0 %v1318_v14  ;;  %1329 = vmatpush3.bf16.msra.mxu1 %v1318_v14  ;;  %v340_v31 = vsel %vm305_vm1, %v337_v5, %v339_v25  ;;  %v322_v14 = vrot.slane %v1723_v44, 2 }
  0x2d   : > { %1323 = vmatprep.subr.bf16.mxu0 %v1322_v22  ;;  %1327 = vmatprep.subr.bf16.mxu1 %v1322_v22  ;;  %v284_v9 = vsel %vm264_vm0, %v281_v49, %v283_v4 }
  0x2e   : > { %484 = vrot.lane.b32.xlu1 %v1543_v26, %s1424_s29  ;;  %468 = vrot.lane.b32.xlu0 %v1546_v27, %s1424_s29 }
  0x30   : > { %1325 = vmatpush3.bf16.msra.mxu0 %v1322_v22  ;;  %1330 = vmatpush3.bf16.msra.mxu1 %v1322_v22 }
  0x31   : > { %1292 = vmatprep.subr.msk.mxu0 %vm953_vm2, %v896_v23  ;;  %1328 = vmatprep.subr.msk.mxu1 %vm953_vm2, %v896_v23 }
  0x32   : > { %486 = vrot.lane.b32.xlu1 %v1549_v28, %s1424_s29  ;;  %470 = vrot.lane.b32.xlu0 %v1552_v29, %s1424_s29 }
  0x34   : > { %1293 = vmatpush3.msk.msra.mxu0 %vm953_vm2, %v896_v23  ;;  %1331 = vmatpush3.msk.msra.mxu1 %vm953_vm2, %v896_v23 }
  0x36   : > { %532 = vrot.lane.b32.xlu1 %v1567_v34, %s1425_s30  ;;  %516 = vrot.lane.b32.xlu0 %v272_v35, %s1425_s30 }
  0x3a   : > { %392 = vrot.lane.b32.xlu1 %v1567_v34, %s1422_s27  ;;  %376 = vrot.lane.b32.xlu0 %v272_v35, %s1422_s27  ;;  %v1699_v35 = vld [vmem:[%s1490_s26 + $0x48] sm:$0xff] }
  0x3b   : > { %2209 = vst [vmem:[#allocation8_spill] sm:$0xff] %v1699_v35  ;;  %v280_v48 = vrot.slane %v1699_v35, 1  ;;  %v321_v13 = vrot.slane %v1699_v35, 2 }
  0x3d   : > { %v282_v58 = vsel %vm264_vm0, %v280_v48, %v281_v49 }
  0x3e   : > { %534 = vrot.lane.b32.xlu1 %v1581_v42, %s1425_s30  ;;  %518 = vrot.lane.b32.xlu0 %v274_v43, %s1425_s30 }
  0x42   : > { %580 = vrot.lane.b32.xlu1 %v1590_v46, %s1426_s4  ;;  %564 = vrot.lane.b32.xlu0 %v313_v47, %s1426_s4 }
  0x46   : > { %394 = vrot.lane.b32.xlu1 %v1581_v42, %s1422_s27  ;;  %378 = vrot.lane.b32.xlu0 %v274_v43, %s1422_s27  ;;  %v1720_v43 = vld [vmem:[%s1490_s26 + $0xb0] sm:$0xff] }
  0x47   : > { %2210 = vst [vmem:[#allocation9_spill] sm:$0xff] %v1720_v43 }
  0x4a   : > { %440 = vrot.lane.b32.xlu1 %v1590_v46, %s1423_s28  ;;  %424 = vrot.lane.b32.xlu0 %v313_v47, %s1423_s28  ;;  %v301_v47 = vrot.slane %v1720_v43, 1 }
  0x4c   : > { %v302_v57 = vsel %vm264_vm0, %v300_v45, %v301_v47 }
  0x4e   : > { %582 = vrot.lane.b32.xlu1 %v1603_v50, %s1426_s4  ;;  %566 = vrot.lane.b32.xlu0 %v315_v51, %s1426_s4 }
  0x52   : > { %628 = vrot.lane.b32.xlu1 %v1610_v52, %s1427_s5  ;;  %612 = vrot.lane.b32.xlu0 %v1613_v53, %s1427_s5 }
  0x56   : > { %442 = vrot.lane.b32.xlu1 %v1603_v50, %s1423_s28  ;;  %426 = vrot.lane.b32.xlu0 %v315_v51, %s1423_s28 }
  0x5a   : > { %488 = vrot.lane.b32.xlu1 %v1610_v52, %s1424_s29  ;;  %472 = vrot.lane.b32.xlu0 %v1613_v53, %s1424_s29 }
  0x5e   : > { %630 = vrot.lane.b32.xlu1 %v1623_v54, %s1427_s5  ;;  %614 = vrot.lane.b32.xlu0 %v1626_v55, %s1427_s5 }
  0x62   : > { %676 = vrot.lane.b32.xlu1 %v297_v60, %s1428_s6  ;;  %660 = vrot.lane.b32.xlu0 %v277_v61, %s1428_s6 }
  0x66   : > { %490 = vrot.lane.b32.xlu1 %v1623_v54, %s1424_s29  ;;  %474 = vrot.lane.b32.xlu0 %v1626_v55, %s1424_s29 }
  0x6a   : > { %536 = vrot.lane.b32.xlu1 %v297_v60, %s1425_s30  ;;  %520 = vrot.lane.b32.xlu0 %v277_v61, %s1425_s30 }
  0x6e   : > { %678 = vrot.lane.b32.xlu1 %v299_v11, %s1428_s6  ;;  %662 = vrot.lane.b32.xlu0 %v279_v12, %s1428_s6 }
  0x72   : > { %724 = vrot.lane.b32.xlu1 %v338_v19, %s1429_s22  ;;  %708 = vrot.lane.b32.xlu0 %v318_v21, %s1429_s22 }
  0x76   : > { %396 = vrot.lane.b32.xlu1 %v297_v60, %s1422_s27  ;;  %380 = vrot.lane.b32.xlu0 %v277_v61, %s1422_s27  ;;  %v233_v61 = vld [vmem:[%s1490_s26 + $0xb8] sm:$0x3] }
  0x77   : > { %v303_v3 = vrot.slane %v233_v61, 1  ;;  %v344_v45 = vrot.slane %v233_v61, 2 }
  0x79   : > { %v304_v8 = vsel %vm264_vm0, %v301_v47, %v303_v3  ;;  %v324_v47 = vrot.slane %v221_v62, 2 }
  0x7a   : > { %538 = vrot.lane.b32.xlu1 %v299_v11, %s1425_s30  ;;  %522 = vrot.lane.b32.xlu0 %v279_v12, %s1425_s30 }
  0x7e   : > { %584 = vrot.lane.b32.xlu1 %v338_v19, %s1426_s4  ;;  %568 = vrot.lane.b32.xlu0 %v318_v21, %s1426_s4 }
  0x82   : > { %726 = vrot.lane.b32.xlu1 %v340_v31, %s1429_s22  ;;  %710 = vrot.lane.b32.xlu0 %v320_v32, %s1429_s22 }
  0x86   : > { %398 = vrot.lane.b32.xlu1 %v299_v11, %s1422_s27  ;;  %382 = vrot.lane.b32.xlu0 %v279_v12, %s1422_s27  ;;  %v341_v11 = vrot.slane %v1696_v33, 2  ;;  %v342_v12 = vrot.slane %v1720_v43, 2 }
  0x8a   : > { %444 = vrot.lane.b32.xlu1 %v338_v19, %s1423_s28  ;;  %428 = vrot.lane.b32.xlu0 %v318_v21, %s1423_s28  ;;  %v343_v19 = vsel %vm305_vm1, %v341_v11, %v342_v12  ;;  %v323_v21 = vsel %vm305_vm1, %v321_v13, %v322_v14 }
  0x8e   : > { %586 = vrot.lane.b32.xlu1 %v340_v31, %s1426_s4  ;;  %570 = vrot.lane.b32.xlu0 %v320_v32, %s1426_s4 }
  0x90   : > { %v1701_v36 = vpop.permute.xlu1 %374  ;;  %v1703_v37 = vpop.permute.xlu0 %372 }
  0x92   : > { %632 = vrot.lane.b32.xlu1 %v1696_v33, %s1427_s5  ;;  %616 = vrot.lane.b32.xlu0 %v1699_v35, %s1427_s5 }
  0x94   : > { %v1709_v38 = vpop.permute.xlu1 %390  ;;  %v1711_v39 = vpop.permute.xlu0 %388 }
  0x96   : > { %446 = vrot.lane.b32.xlu1 %v340_v31, %s1423_s28  ;;  %430 = vrot.lane.b32.xlu0 %v320_v32, %s1423_s28 }
  0x98   : > { %v1715_v40 = vpop.permute.xlu1 %436  ;;  %v1717_v41 = vpop.permute.xlu0 %420 }
  0x9a   : > { %492 = vrot.lane.b32.xlu1 %v1696_v33, %s1424_s29  ;;  %476 = vrot.lane.b32.xlu0 %v1699_v35, %s1424_s29 }
  0x9c   : > { %v1733_v51 = vpop.permute.xlu1 %438  ;;  %v1735_v56 = vpop.permute.xlu0 %422 }
  0x9e   : > { %634 = vrot.lane.b32.xlu1 %v1720_v43, %s1427_s5  ;;  %618 = vrot.lane.b32.xlu0 %v1723_v44, %s1427_s5 }
  0xa0   : > { %v1743_v59 = vpop.permute.xlu1 %484  ;;  %v1745_v60 = vpop.permute.xlu0 %468 }
  0xa2   : > { %680 = vrot.lane.b32.xlu1 %v302_v57, %s1428_s6  ;;  %664 = vrot.lane.b32.xlu0 %v282_v58, %s1428_s6 }
  0xa4   : > { %v1751_v63 = vpop.permute.xlu1 %486  ;;  %v1753_v1 = vpop.permute.xlu0 %470 }
  0xa6   : > { %494 = vrot.lane.b32.xlu1 %v1720_v43, %s1424_s29  ;;  %478 = vrot.lane.b32.xlu0 %v1723_v44, %s1424_s29  ;;  %v1835_v43 = vld [vmem:[%s1490_s26 + $0xc8] sm:$0xff] }
  0xa7   : > { %v350_v46 = vrot.slane %v1835_v43, 1 }
  0xa8   : > { %v1759_v5 = vpop.permute.xlu1 %532  ;;  %v1761_v7 = vpop.permute.xlu0 %516 }
  0xaa   : > { %540 = vrot.lane.b32.xlu1 %v302_v57, %s1425_s30  ;;  %524 = vrot.lane.b32.xlu0 %v282_v58, %s1425_s30 }
  0xac   : > { %v393_v15 = vpop.permute.xlu1 %392  ;;  %v377_v18 = vpop.permute.xlu0 %376 }
  0xad   : > { %v767_v35 = vsel %vm756_vm3, %v1543_v26, %v393_v15  ;;  %v759_v33 = vsel %vm756_vm3, %v1546_v27, %v377_v18 }
  0xae   : > { %682 = vrot.lane.b32.xlu1 %v304_v8, %s1428_s6  ;;  %666 = vrot.lane.b32.xlu0 %v284_v9, %s1428_s6 }
  0xb0   : > { %v1775_v22 = vpop.permute.xlu1 %534  ;;  %v1777_v23 = vpop.permute.xlu0 %518 }
  0xb2   : > { %728 = vrot.lane.b32.xlu1 %v343_v19, %s1429_s22  ;;  %712 = vrot.lane.b32.xlu0 %v323_v21, %s1429_s22 }
  0xb4   : > { %v1781_v25 = vpop.permute.xlu1 %580  ;;  %v1783_v30 = vpop.permute.xlu0 %564 }
  0xb6   : > { %400 = vrot.lane.b32.xlu1 %v302_v57, %s1422_s27  ;;  %384 = vrot.lane.b32.xlu0 %v282_v58, %s1422_s27  ;;  %v345_v57 = vsel %vm305_vm1, %v342_v12, %v344_v45  ;;  %v325_v58 = vsel %vm305_vm1, %v322_v14, %v324_v47  ;;  %v1818_v45 = vld [vmem:[%s1490_s26 + $0xc0] sm:$0xff] }
  0xb7   : > { %v349_v50 = vrot.slane %v1818_v45, 1 }
  0xb8   : > { %v1787_v31 = vpop.permute.xlu1 %394  ;;  %v1789_v32 = vpop.permute.xlu0 %378 }
  0xba   : > { %542 = vrot.lane.b32.xlu1 %v304_v8, %s1425_s30  ;;  %526 = vrot.lane.b32.xlu0 %v284_v9, %s1425_s30 }
  0xbc   : > { %v441_v48 = vpop.permute.xlu1 %440  ;;  %v425_v49 = vpop.permute.xlu0 %424 }
  0xbe   : > { %588 = vrot.lane.b32.xlu1 %v343_v19, %s1426_s4  ;;  %572 = vrot.lane.b32.xlu0 %v323_v21, %s1426_s4 }
  0xc0   : > { %v1797_v3 = vpop.permute.xlu1 %582  ;;  %v1799_v4 = vpop.permute.xlu0 %566 }
  0xc2   : > { %730 = vrot.lane.b32.xlu1 %v345_v57, %s1429_s22  ;;  %714 = vrot.lane.b32.xlu0 %v325_v58, %s1429_s22 }
  0xc4   : > { %v1803_v61 = vpop.permute.xlu1 %628  ;;  %v1805_v62 = vpop.permute.xlu0 %612 }
  0xc6   : > { %402 = vrot.lane.b32.xlu1 %v304_v8, %s1422_s27  ;;  %386 = vrot.lane.b32.xlu0 %v284_v9, %s1422_s27  ;;  %s1241_s27 = sshll.u32 %s2232_s13, 5 }
  0xc8   : > { %v1809_v11 = vpop.permute.xlu1 %442  ;;  %v1811_v12 = vpop.permute.xlu0 %426 }
  0xca   : > { %448 = vrot.lane.b32.xlu1 %v343_v19, %s1423_s28  ;;  %432 = vrot.lane.b32.xlu0 %v323_v21, %s1423_s28 }
  0xcc   : > { %v489_v13 = vpop.permute.xlu1 %488  ;;  %v473_v14 = vpop.permute.xlu0 %472 }
  0xce   : > { %590 = vrot.lane.b32.xlu1 %v345_v57, %s1426_s4  ;;  %574 = vrot.lane.b32.xlu0 %v325_v58, %s1426_s4 }
  0xd0   : > { %v1820_v8 = vpop.permute.xlu1 %630  ;;  %v1822_v9 = vpop.permute.xlu0 %614 }
  0xd2   : > { %636 = vrot.lane.b32.xlu1 %v1818_v45, %s1427_s5  ;;  %620 = vrot.lane.b32.xlu0 %v1507_v10, %s1427_s5 }
  0xd4   : > { %v677_v19 = vpop.permute.xlu1 %676  ;;  %v661_v21 = vpop.permute.xlu0 %660 }
  0xd6   : > { %450 = vrot.lane.b32.xlu1 %v345_v57, %s1423_s28  ;;  %434 = vrot.lane.b32.xlu0 %v325_v58, %s1423_s28  ;;  %v784_v57 = vsel %vm773_vm4, %v767_v35, %v441_v48  ;;  %v776_v58 = vsel %vm773_vm4, %v759_v33, %v425_v49  ;;  %v757_v33 = vsel %vm756_vm3, %v1497_v2, %v1703_v37 }
  0xd7   : > { %v801_v15 = vsel %vm790_vm5, %v784_v57, %v489_v13  ;;  %v793_v42 = vsel %vm790_vm5, %v776_v58, %v473_v14  ;;  %v765_v35 = vsel %vm756_vm3, %v1507_v10, %v1711_v39  ;;  %v351_v49 = vsel %vm264_vm0, %v349_v50, %v350_v46 }
  0xd8   : > { %v1830_v47 = vpop.permute.xlu1 %490  ;;  %v1832_v44 = vpop.permute.xlu0 %474  ;;  %v782_v48 = vsel %vm773_vm4, %v765_v35, %v1715_v40  ;;  %v355_v35 = vrot.slane %v1835_v43, 2 }
  0xd9   : > { %v799_v2 = vsel %vm790_vm5, %v782_v48, %v1743_v59 }
  0xda   : > { %496 = vrot.lane.b32.xlu1 %v1818_v45, %s1424_s29  ;;  %480 = vrot.lane.b32.xlu0 %v1507_v10, %s1424_s29  ;;  %v816_v13 = vsel %vm807_vm6, %v799_v2, %v1759_v5 }
  0xdb   : > { %v833_v50 = vsel %vm824_vm7, %v816_v13, %v1781_v25 }
  0xdc   : > { %v537_v27 = vpop.permute.xlu1 %536  ;;  %v521_v18 = vpop.permute.xlu0 %520  ;;  %v850_v59 = vsel %vm841_vm8, %v833_v50, %v1803_v61 }
  0xdd   : > { %v1852_v34 = vsel %vm807_vm6, %v801_v15, %v537_v27  ;;  %v1855_v55 = vsel %vm807_vm6, %v793_v42, %v521_v18  ;;  %v774_v42 = vsel %vm773_vm4, %v757_v33, %v1717_v41  ;;  %v867_v5 = vsel %vm858_vm9, %v850_v59, %v677_v19 }
  0xde   : > { %638 = vrot.lane.b32.xlu1 %v1835_v43, %s1427_s5  ;;  %622 = vrot.lane.b32.xlu0 %v1502_v6, %s1427_s5  ;;  %v791_v10 = vsel %vm790_vm5, %v774_v42, %v1745_v60  ;;  %v760_v15 = vsel %vm756_vm3, %v1552_v29, %v1789_v32  ;;  %v354_v27 = vrot.slane %v1818_v45, 2 }
  0xdf   : > { %v808_v40 = vsel %vm807_vm6, %v791_v10, %v1761_v7  ;;  %v777_v33 = vsel %vm773_vm4, %v760_v15, %v1811_v12 }
  0xe0   : > { %v679_v37 = vpop.permute.xlu1 %678  ;;  %v663_v39 = vpop.permute.xlu0 %662  ;;  %v825_v41 = vsel %vm824_vm7, %v808_v40, %v1783_v30  ;;  %v236_v30 = vld [vmem:[%s1490_s26 + $0xd0] sm:$0x3]  ;;  %v794_v32 = vsel %vm790_vm5, %v777_v33, %v1832_v44 }
  0xe1   : > { %v842_v60 = vsel %vm841_vm8, %v825_v41, %v1805_v62  ;;  %v352_v61 = vrot.slane %v236_v30, 1 }
  0xe2   : > { %684 = vrot.lane.b32.xlu1 %v351_v49, %s1428_s6  ;;  %668 = vrot.lane.b32.xlu0 %v1520_v17, %s1428_s6  ;;  %v859_v7 = vsel %vm858_vm9, %v842_v60, %v661_v21  ;;  %v768_v21 = vsel %vm756_vm3, %v1549_v28, %v1787_v31 }
  0xe3   : > { %v785_v18 = vsel %vm773_vm4, %v768_v21, %v1809_v11  ;;  %v353_v31 = vsel %vm264_vm0, %v350_v46, %v352_v61  ;;  %v766_v46 = vsel %vm756_vm3, %v1502_v6, %v1709_v38 }
  0xe4   : > { %v725_v25 = vpop.permute.xlu1 %724  ;;  %v709_v14 = vpop.permute.xlu0 %708  ;;  %v802_v29 = vsel %vm790_vm5, %v785_v18, %v1830_v47  ;;  %v356_v47 = vsel %vm305_vm1, %v354_v27, %v355_v35 }
  0xe5   : > { %v884_v57 = vsel %vm875_vm10, %v867_v5, %v725_v25  ;;  %v876_v58 = vsel %vm875_vm10, %v859_v7, %v709_v14  ;;  %v238_v7 = vld [vmem:[%s1490_s26 + $0xe0] sm:$0xff] }
  0xe6   : > { %498 = vrot.lane.b32.xlu1 %v1835_v43, %s1424_s29  ;;  %1306 = vmatprep.mubr.msk.f32.mxu1 %vm904_vm11, %v884_v57  ;;  %v783_v43 = vsel %vm773_vm4, %v766_v46, %v1733_v51  ;;  %v363_v14 = vrot.slane %v238_v7, 1  ;;  %v2212_v57 = vld [vmem:[#allocation6_spill] sm:$0xff] }
  0xe7   : > { %482 = vrot.lane.b32.xlu0 %v1502_v6, %s1424_s29  ;;  %1294 = vmatprep.mubr.msk.f32.mxu0 %vm904_vm11, %v876_v58 }
  0xe8   : > { %v397_v62 = vpop.permute.xlu1 %396  ;;  %v381_v19 = vpop.permute.xlu0 %380 }
  0xe9   : > { %v769_v13 = vsel %vm756_vm3, %v1610_v52, %v397_v62  ;;  %v237_v52 = vld [vmem:[%s1490_s26 + $0xd8] sm:$0xff] }
  0xea   : > { %544 = vrot.lane.b32.xlu1 %v351_v49, %s1425_s30  ;;  %v362_v25 = vrot.slane %v237_v52, 1 }
  0xeb   : > { %528 = vrot.lane.b32.xlu0 %v1520_v17, %s1425_s30  ;;  %v758_v17 = vsel %vm756_vm3, %v1493_v0, %v1701_v36  ;;  %v800_v0 = vsel %vm790_vm5, %v783_v43, %v1751_v63 }
  0xec   : > { %v539_v45 = vpop.permute.xlu1 %538  ;;  %v523_v48 = vpop.permute.xlu0 %522  ;;  %v775_v44 = vsel %vm773_vm4, %v758_v17, %v1735_v56  ;;  %v817_v51 = vsel %vm807_vm6, %v800_v0, %v1775_v22 }
  0xed   : > { %v1923_v11 = vsel %vm807_vm6, %v802_v29, %v539_v45  ;;  %v1926_v12 = vsel %vm807_vm6, %v794_v32, %v523_v48  ;;  %v792_v36 = vsel %vm790_vm5, %v775_v44, %v1753_v1  ;;  %v834_v42 = vsel %vm824_vm7, %v817_v51, %v1797_v3  ;;  %v2213_v29 = vld [vmem:[#allocation2_spill] sm:$0xff]  ;;  %v2214_v48 = vld [vmem:[#allocation3_spill] sm:$0xff] }
  0xee   : > { %686 = vrot.lane.b32.xlu1 %v353_v31, %s1428_s6  ;;  %v809_v56 = vsel %vm807_vm6, %v792_v36, %v1777_v23  ;;  %v851_v63 = vsel %vm841_vm8, %v834_v42, %v1820_v8  ;;  %v357_v8 = vrot.slane %v236_v30, 2 }
  0xef   : > { %670 = vrot.lane.b32.xlu0 %v1517_v16, %s1428_s6  ;;  %v826_v49 = vsel %vm824_vm7, %v809_v56, %v1799_v4  ;;  %v868_v22 = vsel %vm858_vm9, %v851_v63, %v679_v37 }
  0xf0   : > { %v1946_v6 = vpop.permute.xlu1 %584  ;;  %v1948_v38 = vpop.permute.xlu0 %568  ;;  %v843_v1 = vsel %vm841_vm8, %v826_v49, %v1822_v9  ;;  %v2216_v49 = vld [vmem:[#allocation5_spill] sm:$0xff] }
  0xf1   : > { %v860_v23 = vsel %vm858_vm9, %v843_v1, %v663_v39  ;;  %v358_v39 = vsel %vm305_vm1, %v355_v35, %v357_v8  ;;  %v367_v35 = vrot.slane %v237_v52, 2 }
  0xf2   : > { %732 = vrot.lane.b32.xlu1 %v356_v47, %s1429_s22 }
  0xf3   : > { %716 = vrot.lane.b32.xlu0 %v1529_v20, %s1429_s22 }
  0xf4   : > { %v727_v2 = vpop.permute.xlu1 %726  ;;  %v711_v3 = vpop.permute.xlu0 %710 }
  0xf5   : > { %v885_v10 = vsel %vm875_vm10, %v868_v22, %v727_v2  ;;  %v877_v4 = vsel %vm875_vm10, %v860_v23, %v711_v3 }
  0xf6   : > { %546 = vrot.lane.b32.xlu1 %v353_v31, %s1425_s30  ;;  %1307 = vmatmul.mubr.msk.f32.vlgmr.msra.gmra.mrb[0].mxu1 %vm904_vm11, %v885_v10  ;;  %v368_v31 = vrot.slane %v238_v7, 2  ;;  %v835_v10 = vsel %vm824_vm7, %v1852_v34, %v1946_v6 }
  0xf7   : > { %530 = vrot.lane.b32.xlu0 %v1517_v16, %s1425_s30  ;;  %1295 = vmatmul.mubr.msk.f32.vlgmr.msra.gmra.mrb[0].mxu0 %vm904_vm11, %v877_v4  ;;  %v761_v16 = vsel %vm756_vm3, %v1613_v53, %v381_v19  ;;  %v827_v4 = vsel %vm824_vm7, %v1855_v55, %v1948_v38 }
  0xf8   : > { %v399_v9 = vpop.permute.xlu1 %398  ;;  %v383_v37 = vpop.permute.xlu0 %382  ;;  %v369_v17 = vsel %vm305_vm1, %v367_v35, %v368_v31 }
  0xf9   : > { %v770_v30 = vsel %vm756_vm3, %v1623_v54, %v399_v9  ;;  %v762_v58 = vsel %vm756_vm3, %v2212_v57, %v383_v37 }
  0xfa   : > { %592 = vrot.lane.b32.xlu1 %v356_v47, %s1426_s4  ;;  %v2215_v47 = vld [vmem:[#allocation4_spill] sm:$0xff] }
  0xfb   : > { %576 = vrot.lane.b32.xlu0 %v1529_v20, %s1426_s4 }
  0xfc   : > { %v445_v40 = vpop.permute.xlu1 %444  ;;  %v429_v50 = vpop.permute.xlu0 %428 }
  0xfd   : > { %v786_v41 = vsel %vm773_vm4, %v769_v13, %v445_v40  ;;  %v778_v59 = vsel %vm773_vm4, %v761_v16, %v429_v50 }
  0xfe   : > { %734 = vrot.lane.b32.xlu1 %v358_v39, %s1429_s22 }
  0xff   : > { %718 = vrot.lane.b32.xlu0 %v1536_v24, %s1429_s22 }
 0x100   : > { %v1987_v20 = vpop.permute.xlu1 %586  ;;  %v1989_v60 = vpop.permute.xlu0 %570 }
 0x102   : > { %594 = vrot.lane.b32.xlu1 %v358_v39, %s1426_s4 }
 0x103   : > { %578 = vrot.lane.b32.xlu0 %v1536_v24, %s1426_s4  ;;  %v239_v24 = vld [vmem:[%s1490_s26 + $0xe8] sm:$0x3]  ;;  %s1240_s26 = sshll.u32 %s2234_s25, 1 }
 0x104   : > { %v633_v53 = vpop.permute.xlu1 %632  ;;  %v617_v5 = vpop.permute.xlu0 %616  ;;  %v365_v15 = vrot.slane %v239_v24, 1  ;;  %v370_v46 = vrot.slane %v239_v24, 2  ;;  %s206_s28 = sadd.s32 %s1241_s27, %s1240_s26 }
 0x105   : > { %v852_v8 = vsel %vm841_vm8, %v835_v10, %v633_v53  ;;  %v844_v9 = vsel %vm841_vm8, %v827_v4, %v617_v5  ;;  %v836_v5 = vsel %vm824_vm7, %v1923_v11, %v1987_v20  ;;  %v2217_v20 = vld [vmem:[#allocation7_spill] sm:$0xff]  ;;  %s1242_s4 = sshll.u32 %s206_s28, 3 }
 0x106   : > { %640 = vrot.lane.b32.xlu1 %v237_v52, %s1427_s5  ;;  %v366_v32 = vsel %vm264_vm0, %v363_v14, %v365_v15  ;;  %v371_v0 = vsel %vm305_vm1, %v368_v31, %v370_v46  ;;  %s2141_s7 = scalar_lea.vmem %s2193_s3, %s1242_s4 }
 0x107   : > { %624 = vrot.lane.b32.xlu0 %v1543_v26, %s1427_s5  ;;  %v364_v26 = vsel %vm264_vm0, %v362_v25, %v363_v14 }
 0x108   : > { %v447_v61 = vpop.permute.xlu1 %446  ;;  %v431_v62 = vpop.permute.xlu0 %430 }
 0x109   : > { %v787_v19 = vsel %vm773_vm4, %v770_v30, %v447_v61  ;;  %v779_v21 = vsel %vm773_vm4, %v762_v58, %v431_v62 }
 0x10a   : > { %642 = vrot.lane.b32.xlu1 %v238_v7, %s1427_s5  ;;  %v828_v7 = vsel %vm824_vm7, %v1926_v12, %v1989_v60 }
 0x10b   : > { %626 = vrot.lane.b32.xlu0 %v1549_v28, %s1427_s5 }
 0x10c   : > { %v493_v27 = vpop.permute.xlu1 %492  ;;  %v477_v54 = vpop.permute.xlu0 %476 }
 0x10d   : > { %v803_v18 = vsel %vm790_vm5, %v786_v41, %v493_v27  ;;  %v795_v33 = vsel %vm790_vm5, %v778_v59, %v477_v54 }
 0x10e   : > { %688 = vrot.lane.b32.xlu1 %v364_v26, %s1428_s6 }
 0x10f   : > { %672 = vrot.lane.b32.xlu0 %v2213_v29, %s1428_s6 }
 0x110   : > { %v635_v45 = vpop.permute.xlu1 %634  ;;  %v619_v28 = vpop.permute.xlu0 %618 }
 0x111   : > { %v853_v25 = vsel %vm841_vm8, %v836_v5, %v635_v45  ;;  %v845_v14 = vsel %vm841_vm8, %v828_v7, %v619_v28 }
 0x112   : > { %690 = vrot.lane.b32.xlu1 %v366_v32, %s1428_s6 }
 0x113   : > { %674 = vrot.lane.b32.xlu0 %v2214_v48, %s1428_s6 }
 0x114   : > { %v681_v43 = vpop.permute.xlu1 %680  ;;  %v665_v44 = vpop.permute.xlu0 %664 }
 0x115   : > { %v869_v37 = vsel %vm858_vm9, %v852_v8, %v681_v43  ;;  %v861_v39 = vsel %vm858_vm9, %v844_v9, %v665_v44 }
 0x116   : > { %736 = vrot.lane.b32.xlu1 %v369_v17, %s1429_s22 }
 0x117   : > { %720 = vrot.lane.b32.xlu0 %v2215_v47, %s1429_s22 }
 0x118   : > { %v495_v36 = vpop.permute.xlu1 %494  ;;  %v479_v51 = vpop.permute.xlu0 %478 }
 0x119   : > { %v804_v56 = vsel %vm790_vm5, %v787_v19, %v495_v36  ;;  %v796_v42 = vsel %vm790_vm5, %v779_v21, %v479_v51  ;;  %v2218_v19 = vld [vmem:[#allocation8_spill] sm:$0xff] }
 0x11a   : > { %738 = vrot.lane.b32.xlu1 %v371_v0, %s1429_s22 }
 0x11b   : > { %722 = vrot.lane.b32.xlu0 %v2216_v49, %s1429_s22 }
 0x11c   : > { %v541_v63 = vpop.permute.xlu1 %540  ;;  %v525_v1 = vpop.permute.xlu0 %524 }
 0x11d   : > { %v2030_v22 = vsel %vm807_vm6, %v803_v18, %v541_v63  ;;  %v2033_v23 = vsel %vm807_vm6, %v795_v33, %v525_v1 }
 0x120   : > { %v683_v2 = vpop.permute.xlu1 %682  ;;  %v667_v3 = vpop.permute.xlu0 %666 }
 0x121   : > { %v870_v30 = vsel %vm858_vm9, %v853_v25, %v683_v2  ;;  %v862_v57 = vsel %vm858_vm9, %v845_v14, %v667_v3 }
 0x124   : > { %v729_v13 = vpop.permute.xlu1 %728  ;;  %v713_v16 = vpop.permute.xlu0 %712 }
 0x125   : > { %v886_v40 = vsel %vm875_vm10, %v869_v37, %v729_v13  ;;  %v878_v50 = vsel %vm875_vm10, %v861_v39, %v713_v16 }
 0x126   : > { %1297 = vmatprep.mubr.msk.f32.mxu0 %vm904_vm11, %v878_v50  ;;  %1309 = vmatprep.mubr.msk.f32.mxu1 %vm904_vm11, %v886_v40 }
 0x128   : > { %v401_v34 = vpop.permute.xlu1 %400  ;;  %v385_v55 = vpop.permute.xlu0 %384 }
 0x129   : > { %v771_v60 = vsel %vm756_vm3, %v2217_v20, %v401_v34  ;;  %v763_v21 = vsel %vm756_vm3, %v2218_v19, %v385_v55 }
 0x12c   : > { %v543_v6 = vpop.permute.xlu1 %542  ;;  %v527_v38 = vpop.permute.xlu0 %526 }
 0x12d   : > { %v821_v41 = vsel %vm807_vm6, %v804_v56, %v543_v6  ;;  %v813_v59 = vsel %vm807_vm6, %v796_v42, %v527_v38 }
 0x130   : > { %v589_v52 = vpop.permute.xlu1 %588  ;;  %v573_v53 = vpop.permute.xlu0 %572 }
 0x131   : > { %v837_v42 = vsel %vm824_vm7, %v2030_v22, %v589_v52  ;;  %v829_v49 = vsel %vm824_vm7, %v2033_v23, %v573_v53 }
 0x134   : > { %v731_v58 = vpop.permute.xlu1 %730  ;;  %v715_v61 = vpop.permute.xlu0 %714 }
 0x135   : > { %v887_v62 = vsel %vm875_vm10, %v870_v30, %v731_v58  ;;  %v879_v24 = vsel %vm875_vm10, %v862_v57, %v715_v61 }
 0x136   : > { %1298 = vmatmul.mubr.msk.f32.gmra.mrb[2].mxu0 %vm904_vm11, %v879_v24  ;;  %1310 = vmatmul.mubr.msk.f32.gmra.mrb[2].mxu1 %vm904_vm11, %v887_v62 }
 0x138   : > { %v2065_v11 = vpop.permute.xlu1 %402  ;;  %v2067_v12 = vpop.permute.xlu0 %386 }
 0x13c   : > { %v449_v26 = vpop.permute.xlu1 %448  ;;  %v433_v15 = vpop.permute.xlu0 %432 }
 0x13d   : > { %v788_v27 = vsel %vm773_vm4, %v771_v60, %v449_v26  ;;  %v780_v54 = vsel %vm773_vm4, %v763_v21, %v433_v15  ;;  %v2219_v60 = vld [vmem:[#allocation9_spill] sm:$0xff]  ;;  %v2220_v15 = vld [vmem:[#allocation10_spill] sm:$0xff] }
 0x13e   : > { %v772_v19 = vsel %vm756_vm3, %v2219_v60, %v2065_v11 }
 0x140   : > { %v591_v18 = vpop.permute.xlu1 %590  ;;  %v575_v33 = vpop.permute.xlu0 %574 }
 0x141   : > { %v838_v13 = vsel %vm824_vm7, %v821_v41, %v591_v18  ;;  %v830_v16 = vsel %vm824_vm7, %v813_v59, %v575_v33  ;;  %v764_v18 = vsel %vm756_vm3, %v2220_v15, %v2067_v12 }
 0x144   : > { %v637_v35 = vpop.permute.xlu1 %636  ;;  %v621_v31 = vpop.permute.xlu0 %620 }
 0x145   : > { %v854_v63 = vsel %vm841_vm8, %v837_v42, %v637_v35  ;;  %v846_v1 = vsel %vm841_vm8, %v829_v49, %v621_v31 }
 0x148   : > { %v451_v29 = vpop.permute.xlu1 %450  ;;  %v435_v32 = vpop.permute.xlu0 %434 }
 0x149   : > { %v781_v35 = vsel %vm773_vm4, %v764_v18, %v435_v32 }
 0x14c   : > { %v497_v45 = vpop.permute.xlu1 %496  ;;  %v481_v28 = vpop.permute.xlu0 %480 }
 0x14d   : > { %v805_v58 = vsel %vm790_vm5, %v788_v27, %v497_v45  ;;  %v797_v62 = vsel %vm790_vm5, %v780_v54, %v481_v28  ;;  %v789_v27 = vsel %vm773_vm4, %v772_v19, %v451_v29 }
 0x150   : > { %v639_v48 = vpop.permute.xlu1 %638  ;;  %v623_v17 = vpop.permute.xlu0 %622 }
 0x151   : > { %v855_v40 = vsel %vm841_vm8, %v838_v13, %v639_v48  ;;  %v847_v50 = vsel %vm841_vm8, %v830_v16, %v623_v17 }
 0x154   : > { %v685_v46 = vpop.permute.xlu1 %684  ;;  %v669_v43 = vpop.permute.xlu0 %668 }
 0x155   : > { %v871_v2 = vsel %vm858_vm9, %v854_v63, %v685_v46  ;;  %v863_v10 = vsel %vm858_vm9, %v846_v1, %v669_v43 }
 0x158   : > { %v499_v44 = vpop.permute.xlu1 %498 }
 0x159   : > { %v483_v47 = vpop.permute.xlu0 %482  ;;  %v806_v31 = vsel %vm790_vm5, %v789_v27, %v499_v44 }
 0x15a   : > { %v798_v48 = vsel %vm790_vm5, %v781_v35, %v483_v47 }
 0x15c   : > { %v545_v0 = vpop.permute.xlu1 %544 }
 0x15d   : > { %v529_v36 = vpop.permute.xlu0 %528  ;;  %v822_v24 = vsel %vm807_vm6, %v805_v58, %v545_v0 }
 0x15e   : > { %v814_v21 = vsel %vm807_vm6, %v797_v62, %v529_v36 }
 0x160   : > { %v687_v51 = vpop.permute.xlu1 %686 }
 0x161   : > { %v671_v56 = vpop.permute.xlu0 %670  ;;  %v872_v34 = vsel %vm858_vm9, %v855_v40, %v687_v51 }
 0x162   : > { %v864_v6 = vsel %vm858_vm9, %v847_v50, %v671_v56 }
 0x164   : > { %v733_v3 = vpop.permute.xlu1 %732 }
 0x165   : > { %v888_v4 = vsel %vm875_vm10, %v871_v2, %v733_v3  ;;  %v717_v8 = vpop.permute.xlu0 %716  ;;  %v1243_v2 = vld [vmem:[%s2192_s2] ss:$0 sm:$0xff] }
 0x166   : > { %v880_v9 = vsel %vm875_vm10, %v863_v10, %v717_v8  ;;  %1312 = vmatprep.mubr.msk.f32.mxu1 %vm904_vm11, %v888_v4 }
 0x167   : > { %1300 = vmatprep.mubr.msk.f32.mxu0 %vm904_vm11, %v880_v9 }
 0x168   : > { %v547_v22 = vpop.permute.xlu1 %546 }
 0x169   : > { %v531_v23 = vpop.permute.xlu0 %530  ;;  %v823_v17 = vsel %vm807_vm6, %v806_v31, %v547_v22 }
 0x16a   : > { %v815_v43 = vsel %vm807_vm6, %v798_v48, %v531_v23 }
 0x16c   : > { %v593_v37 = vpop.permute.xlu1 %592 }
 0x16d   : > { %v577_v39 = vpop.permute.xlu0 %576  ;;  %v839_v26 = vsel %vm824_vm7, %v822_v24, %v593_v37 }
 0x16e   : > { %v831_v33 = vsel %vm824_vm7, %v814_v21, %v577_v39 }
 0x170   : > { %v735_v55 = vpop.permute.xlu1 %734 }
 0x171   : > { %v889_v38 = vsel %vm875_vm10, %v872_v34, %v735_v55  ;;  %v719_v52 = vpop.permute.xlu0 %718 }
 0x172   : > { %v881_v53 = vsel %vm875_vm10, %v864_v6, %v719_v52  ;;  %1313 = vmatmul.mubr.msk.f32.gmra.mrb[4].mxu1 %vm904_vm11, %v889_v38 }
 0x173   : > { %1301 = vmatmul.mubr.msk.f32.gmra.mrb[4].mxu0 %vm904_vm11, %v881_v53 }
 0x174   : > { %v595_v41 = vpop.permute.xlu1 %594 }
 0x175   : > { %v579_v59 = vpop.permute.xlu0 %578  ;;  %v840_v32 = vsel %vm824_vm7, %v823_v17, %v595_v41 }
 0x176   : > { %v832_v0 = vsel %vm824_vm7, %v815_v43, %v579_v59 }
 0x178   : > { %v641_v5 = vpop.permute.xlu1 %640 }
 0x179   : > { %v625_v7 = vpop.permute.xlu0 %624  ;;  %v856_v54 = vsel %vm841_vm8, %v839_v26, %v641_v5 }
 0x17a   : > { %v848_v11 = vsel %vm841_vm8, %v831_v33, %v625_v7 }
 0x17c   : > { %v643_v25 = vpop.permute.xlu1 %642 }
 0x17d   : > { %v627_v14 = vpop.permute.xlu0 %626  ;;  %v857_v47 = vsel %vm841_vm8, %v840_v32, %v643_v25 }
 0x17e   : > { %v849_v36 = vsel %vm841_vm8, %v832_v0, %v627_v14 }
 0x180   : > { %v689_v30 = vpop.permute.xlu1 %688 }
 0x181   : > { %v673_v57 = vpop.permute.xlu0 %672  ;;  %v873_v45 = vsel %vm858_vm9, %v856_v54, %v689_v30 }
 0x182   : > { %v865_v12 = vsel %vm858_vm9, %v848_v11, %v673_v57 }
 0x184   : > { %v691_v61 = vpop.permute.xlu1 %690 }
 0x185   : > { %v675_v20 = vpop.permute.xlu0 %674  ;;  %v874_v51 = vsel %vm858_vm9, %v857_v47, %v691_v61 }
 0x186   : > { %v866_v42 = vsel %vm858_vm9, %v849_v36, %v675_v20 }
 0x188   : > { %v737_v28 = vpop.permute.xlu1 %736 }
 0x189   : > { %v890_v29 = vsel %vm875_vm10, %v873_v45, %v737_v28  ;;  %v721_v46 = vpop.permute.xlu0 %720 }
 0x18a   : > { %v882_v44 = vsel %vm875_vm10, %v865_v12, %v721_v46  ;;  %1315 = vmatprep.mubr.msk.f32.mxu1 %vm904_vm11, %v890_v29 }
 0x18b   : > { %1303 = vmatprep.mubr.msk.f32.mxu0 %vm904_vm11, %v882_v44 }
 0x18c   : > { %v739_v56 = vpop.permute.xlu1 %738 }
 0x18d   : > { %v891_v49 = vsel %vm875_vm10, %v874_v51, %v739_v56  ;;  %v723_v63 = vpop.permute.xlu0 %722 }
 0x18e   : > { %v883_v1 = vsel %vm875_vm10, %v866_v42, %v723_v63  ;;  %1316 = vmatmul.mubr.msk.f32.gmra.mrb[6].mxu1 %vm904_vm11, %v891_v49 }
 0x18f   : > { %1304 = vmatmul.mubr.msk.f32.gmra.mrb[6].mxu0 %vm904_vm11, %v883_v1 }
 0x1c9   : > { %v1308_v3 = vpop.f32.mrb[0].mxu1 }
 0x1ca   : > { %v1296_v10 = vpop.f32.mrb[0].mxu0  ;;  %v1069_v4 = vadd.f32 %v1308_v3, %v1243_v2  ;;  %v1063_v8 = vpop.f32.mrb[1].mxu1 }
 0x1cb   : > { %v1029_v9 = vadd.f32 %v1296_v10, %v1243_v2  ;;  %v1023_v22 = vpop.f32.mrb[1].mxu0  ;;  %v1064_v23 = vadd.f32 %v1243_v2, %v1063_v8 }
 0x1cc   : > { %v1111_v37 = vmax.f32 %v1069_v4, 0.0  ;;  %v1024_v39 = vadd.f32 %v1243_v2, %v1023_v22 }
 0x1cd   : > { %v1103_v13 = vmax.f32 %v1029_v9, 0.0  ;;  %v1110_v16 = vmax.f32 %v1064_v23, 0.0 }
 0x1ce   : > { %1127 = vst.msk [vmem:[%s2141_s7 + $0x48] sm:$0xff] %vm875_vm10, %v1111_v37  ;;  %v1102_v40 = vmax.f32 %v1024_v39, 0.0 }
 0x1cf   : > { %1119 = vst.msk [vmem:[%s2141_s7 + $0x8] sm:$0xff] %vm875_vm10, %v1103_v13  ;;  %1126 = vst.msk [vmem:[%s2141_s7 + $0x40] sm:$0xff] %vm875_vm10, %v1110_v16 }
 0x1d0   : > { %1118 = vst.msk [vmem:[%s2141_s7] sm:$0xff] %vm875_vm10, %v1102_v40 }
 0x209   : > { %v1299_v50 = vpop.f32.mrb[2].mxu0  ;;  %v1311_v34 = vpop.f32.mrb[2].mxu1 }
 0x20a   : > { %v1039_v55 = vadd.f32 %v1299_v50, %v1243_v2  ;;  %v1079_v6 = vadd.f32 %v1311_v34, %v1243_v2  ;;  %v1033_v38 = vpop.f32.mrb[3].mxu0  ;;  %v1073_v52 = vpop.f32.mrb[3].mxu1 }
 0x20b   : > { %v1034_v53 = vadd.f32 %v1243_v2, %v1033_v38  ;;  %v1074_v41 = vadd.f32 %v1243_v2, %v1073_v52 }
 0x20c   : > { %v1105_v59 = vmax.f32 %v1039_v55, 0.0  ;;  %v1113_v5 = vmax.f32 %v1079_v6, 0.0 }
 0x20d   : > { %v1104_v7 = vmax.f32 %v1034_v53, 0.0  ;;  %v1112_v25 = vmax.f32 %v1074_v41, 0.0 }
 0x20e   : > { %1121 = vst.msk [vmem:[%s2141_s7 + $0x18] sm:$0xff] %vm875_vm10, %v1105_v59  ;;  %1129 = vst.msk [vmem:[%s2141_s7 + $0x58] sm:$0xff] %vm875_vm10, %v1113_v5 }
 0x20f   : > { %1120 = vst.msk [vmem:[%s2141_s7 + $0x10] sm:$0xff] %vm875_vm10, %v1104_v7  ;;  %1128 = vst.msk [vmem:[%s2141_s7 + $0x50] sm:$0xff] %vm875_vm10, %v1112_v25 }
 0x245   : > { %v1314_v14 = vpop.f32.mrb[4].mxu1 }
 0x246   : > { %v1302_v30 = vpop.f32.mrb[4].mxu0  ;;  %v1089_v57 = vadd.f32 %v1314_v14, %v1243_v2  ;;  %v1083_v58 = vpop.f32.mrb[5].mxu1 }
 0x247   : > { %v1049_v61 = vadd.f32 %v1302_v30, %v1243_v2  ;;  %v1043_v62 = vpop.f32.mrb[5].mxu0  ;;  %v1084_v24 = vadd.f32 %v1243_v2, %v1083_v58 }
 0x248   : > { %v1115_v20 = vmax.f32 %v1089_v57, 0.0  ;;  %v1044_v60 = vadd.f32 %v1243_v2, %v1043_v62 }
 0x249   : > { %v1107_v19 = vmax.f32 %v1049_v61, 0.0  ;;  %v1114_v21 = vmax.f32 %v1084_v24, 0.0 }
 0x24a   : > { %1131 = vst.msk [vmem:[%s2141_s7 + $0x68] sm:$0xff] %vm875_vm10, %v1115_v20  ;;  %v1106_v26 = vmax.f32 %v1044_v60, 0.0 }
 0x24b   : > { %1123 = vst.msk [vmem:[%s2141_s7 + $0x28] sm:$0xff] %vm875_vm10, %v1107_v19  ;;  %1130 = vst.msk [vmem:[%s2141_s7 + $0x60] sm:$0xff] %vm875_vm10, %v1114_v21 }
 0x24c   : > { %1122 = vst.msk [vmem:[%s2141_s7 + $0x20] sm:$0xff] %vm875_vm10, %v1106_v26 }
 0x261   : > { %v1317_v15 = vpop.f32.mrb[6].mxu1 }
 0x262   : > { %v1305_v18 = vpop.f32.mrb[6].mxu0  ;;  %v1099_v27 = vadd.f32 %v1317_v15, %v1243_v2  ;;  %v1093_v33 = vpop.f32.mrb[7].mxu1 }
 0x263   : > { %v1059_v54 = vadd.f32 %v1305_v18, %v1243_v2  ;;  %v1053_v35 = vpop.f32.mrb[7].mxu0  ;;  %v1094_v31 = vadd.f32 %v1243_v2, %v1093_v33 }
 0x264   : > { %v1117_v11 = vmax.f32 %v1099_v27, 0.0  ;;  %v1054_v45 = vadd.f32 %v1243_v2, %v1053_v35 }
 0x265   : > { %v1109_v28 = vmax.f32 %v1059_v54, 0.0  ;;  %v1116_v48 = vmax.f32 %v1094_v31, 0.0 }
 0x266   : > { %1133 = vst.msk [vmem:[%s2141_s7 + $0x78] sm:$0xff] %vm875_vm10, %v1117_v11  ;;  %v1108_v17 = vmax.f32 %v1054_v45, 0.0 }
 0x267   : > { %1125 = vst.msk [vmem:[%s2141_s7 + $0x38] sm:$0xff] %vm875_vm10, %v1109_v28  ;;  %1132 = vst.msk [vmem:[%s2141_s7 + $0x70] sm:$0xff] %vm875_vm10, %v1116_v48 }
 0x268   : > { %1124 = vst.msk [vmem:[%s2141_s7 + $0x30] sm:$0xff] %vm875_vm10, %v1108_v17 }
 0x269 PF: > { %s13_s16 = sadd.s32 1, %s1420_s16   ;;  %s2221_s12 = smov %s1412_s14 }
 0x26a   : > { %p10_p8 = scmp.ge.s32.totalorder %s13_s16, 6   ;;  %s2222_s13 = smov %s1416_s15 }
 0x26b   : > { %s2223_s14 = smov %s2226_s17  ;;  %s2224_s15 = smov %s2230_s18 }
 0x26c   :  { %12 = sbr.rel (!%p10_p8) target bundleno = 3 (0x3), region = 62 }

</bundles_post_ra>
